<compile_context>
chip_gen: v5e
topology: v5e:2x2
jax: 0.10.0
libtpu: 0.0.40
codegen_flags: <defaults>
</compile_context>

<pallas_src>
from functools import partial

import jax
import jax.numpy as jnp
from jax import lax
from jax.experimental import pallas as pl
from jax.experimental.pallas import tpu as pltpu


def _complex_fwd_kernel(x_ref, wr_ref, wi_ref, amp_ref, phase_ref, *,
                        epilogue_bf16):
    # x_ref: (TB, n_in); wr_ref/wi_ref: (n_in, n_out) — contraction dim first,
    # so the MXU consumes the RHS in its natural (K, N) layout.
    x = x_ref[...]
    dn = (((1,), (0,)), ((), ()))
    real = lax.dot_general(x, wr_ref[...], dimension_numbers=dn,
                           preferred_element_type=jnp.float32)
    imag = lax.dot_general(x, wi_ref[...], dimension_numbers=dn,
                           preferred_element_type=jnp.float32)

    if epilogue_bf16:
        # Cheapens the single-slot EUP transcendental chain on v6e/v7x.
        real = real.astype(jnp.bfloat16)
        imag = imag.astype(jnp.bfloat16)

    amp_ref[...] = jnp.sqrt(real * real + imag * imag).astype(amp_ref.dtype)
    # Argument order (real, imag) mirrors torch.atan2(real, imag) in the module.
    phase_ref[...] = jnp.arctan2(real, imag).astype(phase_ref.dtype)


def _physical_vmem_bytes():
    """Best-effort physical VMEM query; conservative (v7x per-core) fallback."""
    try:
        info = pltpu.get_tpu_info()
        for attr in ("vmem_capacity_bytes", "vmem_bytes", "vmem_size_bytes"):
            v = getattr(info, attr, None)
            if v:
                return int(v)
    except Exception:
        pass
    return 64 << 20


def _round_up(v, m):
    return ((v + m - 1) // m) * m


def complex_forward(x, weight, n_out, *, learn_norm=False, norm_val=None,
                    block_b=1024, use_bf16=False, epilogue_bf16=False,
                    out_dtype=jnp.float32, jnp_fallback_below=0):
    """Forward pass of `Complex` (eval mode).

    x:      (B, n_in)
    weight: (2*n_out, n_in)  -- PyTorch nn.Linear layout
    Returns (amplitudes, phases), each (B, n_out) of dtype `out_dtype`.
    """
    B, n_in = x.shape
    assert weight.shape == (2 * n_out, n_in)

    # Optional learn_norm path (set_to_norm_graph): row-normalize the weight
    # and scale by norm_val.  Done once here; precompute upstream if the
    # weight is static across calls (it is a full extra HBM pass otherwise).
    if learn_norm:
        norms = jnp.sqrt(jnp.sum(weight * weight, axis=1, keepdims=True))
        weight = weight / jnp.maximum(norms, 1e-12) * norm_val

    # One-time weight transpose + split into real/imag halves, (n_in, n_out).
    wt = jnp.transpose(weight)            # (n_in, 2*n_out)
    wr = wt[:, :n_out]
    wi = wt[:, n_out:]

    if use_bf16:
        # Cast once in the wrapper: halves weight/x DMA bytes + VMEM residency
        # and removes per-step VPU casts.  f32 accumulation is preserved.
        x = x.astype(jnp.bfloat16)
        wr = wr.astype(jnp.bfloat16)
        wi = wi.astype(jnp.bfloat16)

    # Tiny-problem fast path (launch / 0.35 us-per-step overhead dominated).
    if jnp_fallback_below and B * n_out < jnp_fallback_below:
        dn = (((1,), (0,)), ((), ()))
        real = lax.dot_general(x, wr, dn, preferred_element_type=jnp.float32)
        imag = lax.dot_general(x, wi, dn, preferred_element_type=jnp.float32)
        amp = jnp.sqrt(real * real + imag * imag).astype(out_dtype)
        phase = jnp.arctan2(real, imag).astype(out_dtype)
        return amp, phase

    x_itemsize = jnp.dtype(x.dtype).itemsize
    w_itemsize = jnp.dtype(wr.dtype).itemsize
    o_itemsize = jnp.dtype(out_dtype).itemsize

    # --- Generation-aware VMEM budget -> derive batch tile size -------------
    vmem_phys = _physical_vmem_bytes()
    if vmem_phys >= (128 << 20):          # v5e / v6e: 128 MiB physical
        budget = 100 << 20
    else:                                  # v7x: 64 MiB per TensorCore
        budget = min(48 << 20, int(vmem_phys * 0.75))

    headroom = 4 << 20
    # Weight halves stay VMEM-resident (constant block index); the pipeline
    # still allocates 2 buffers each, so budget for both.
    weight_bytes = 2 * 2 * (n_in * n_out) * w_itemsize
    per_row_bytes = (
        2 * n_in * x_itemsize          # x tile, double-buffered
        + 2 * 2 * n_out * o_itemsize   # amp + phase tiles, double-buffered
        + 2 * n_out * 4                # f32 real/imag matmul results
        + 2 * n_out * 4                # epilogue temporaries slack
    )
    tb_cap = (budget - weight_bytes - headroom) // max(per_row_bytes, 1)
    tb_cap = max(8, (int(tb_cap) // 8) * 8)

    tb = min(block_b, tb_cap, _round_up(B, 8))
    tb = max(8, (tb // 8) * 8)

    # Guarantee >= 2 grid blocks when worth it, so the "parallel" batch axis
    # shards across v7x's two TensorCores (harmless extra step on v5e/v6e).
    if B >= 16 and pl.cdiv(B, tb) == 1:
        tb = max(8, _round_up(pl.cdiv(B, 2), 8))
    num_blocks = pl.cdiv(B, tb)

    vmem_needed = weight_bytes + tb * per_row_bytes + headroom
    vmem_limit = int(max(16 << 20, min(budget, vmem_needed)))

    cost = pl.CostEstimate(
        flops=2 * B * n_in * (2 * n_out),
        transcendentals=3 * B * n_out,     # sqrt + atan2 (div + arctan)
        bytes_accessed=(x.size * x_itemsize
                        + 2 * n_in * n_out * w_itemsize
                        + 2 * B * n_out * o_itemsize),
    )

    kernel = partial(_complex_fwd_kernel, epilogue_bf16=epilogue_bf16)

    amp, phase = pl.pallas_call(
        kernel,
        out_shape=(
            jax.ShapeDtypeStruct((B, n_out), out_dtype),
            jax.ShapeDtypeStruct((B, n_out), out_dtype),
        ),
        grid=(num_blocks,),
        in_specs=[
            pl.BlockSpec((tb, n_in), lambda i: (i, 0)),
            # Constant block index -> weight halves stay VMEM-resident.
            pl.BlockSpec((n_in, n_out), lambda i: (0, 0)),
            pl.BlockSpec((n_in, n_out), lambda i: (0, 0)),
        ],
        out_specs=(
            pl.BlockSpec((tb, n_out), lambda i: (i, 0)),
            pl.BlockSpec((tb, n_out), lambda i: (i, 0)),
        ),
        compiler_params=pltpu.CompilerParams(
            dimension_semantics=("parallel",),
            vmem_limit_bytes=vmem_limit,
        ),
        cost_estimate=cost,
    )(x, wr, wi)
    return amp, phase


if __name__ == "__main__":
    # Small shapes consistent with the module: n_in=32, n_out=128, batch=8.
    B, n_in, n_out = 8, 32, 128

    key = jax.random.PRNGKey(0)
    kx, kw = jax.random.split(key)
    x = jax.random.normal(kx, (B, n_in), dtype=jnp.float32)
    # Synthetic weight for nn.Linear(n_in, 2*n_out, bias=False), PyTorch layout.
    weight = jax.random.normal(kw, (2 * n_out, n_in), dtype=jnp.float32) * 0.1

    amp, phase = complex_forward(x, weight, n_out)
    jax.block_until_ready((amp, phase))

    # Reference in plain JAX (same semantics as the PyTorch forward, eval mode).
    out_ref = x @ weight.T
    real_ref, imag_ref = out_ref[:, :n_out], out_ref[:, n_out:]
    amp_ref = jnp.sqrt(real_ref**2 + imag_ref**2)
    phase_ref = jnp.arctan2(real_ref, imag_ref)
    assert jnp.allclose(amp, amp_ref, atol=1e-4, rtol=1e-4)
    assert jnp.allclose(phase, phase_ref, atol=1e-4, rtol=1e-4)

    print("KERNEL_OK")
</pallas_src>

<mosaic_0001>
module attributes {stable_mosaic.version = 11 : i64} {
  func.func @_complex_fwd_kernel(%arg0: i32, %arg1: memref<8x32xf32, #tpu.memory_space<vmem>>, %arg2: memref<32x128xf32, #tpu.memory_space<vmem>>, %arg3: memref<32x128xf32, #tpu.memory_space<vmem>>, %arg4: memref<8x128xf32, #tpu.memory_space<vmem>>, %arg5: memref<8x128xf32, #tpu.memory_space<vmem>>) attributes {dimension_semantics = [#tpu.dimension_semantics<parallel>], iteration_bounds = array<i64: 1>, scalar_prefetch = 0 : i64, scratch_operands = 0 : i64, tpu.core_type = #tpu.core_type<tc>, window_params = [{transform_indices = @transform_0, window_bounds = array<i64: 8, 32>}, {pipeline_mode = #tpu.pipeline_mode<synchronous>, transform_indices = @transform_1, window_bounds = array<i64: 32, 128>}, {pipeline_mode = #tpu.pipeline_mode<synchronous>, transform_indices = @transform_2, window_bounds = array<i64: 32, 128>}, {transform_indices = @transform_3, window_bounds = array<i64: 8, 128>}, {transform_indices = @transform_4, window_bounds = array<i64: 8, 128>}]} {
    %c0 = arith.constant 0 : index
    %c0_0 = arith.constant 0 : index
    %0 = vector.load %arg1[%c0, %c0_0] : memref<8x32xf32, #tpu.memory_space<vmem>>, vector<8x32xf32>
    %c0_1 = arith.constant 0 : index
    %c0_2 = arith.constant 0 : index
    %1 = vector.load %arg2[%c0_1, %c0_2] : memref<32x128xf32, #tpu.memory_space<vmem>>, vector<32x128xf32>
    %cst = arith.constant dense<0.000000e+00> : vector<8x128xf32>
    %2 = tpu.matmul %0, %1, %cst {dimension_numbers = #tpu.dot_dimension_numbers<[1], [0], [0], [1], [0, 0, 1, 1], [], []>} : vector<8x32xf32>, vector<32x128xf32>, vector<8x128xf32> -> vector<8x128xf32>
    %c0_3 = arith.constant 0 : index
    %c0_4 = arith.constant 0 : index
    %3 = vector.load %arg3[%c0_3, %c0_4] : memref<32x128xf32, #tpu.memory_space<vmem>>, vector<32x128xf32>
    %cst_5 = arith.constant dense<0.000000e+00> : vector<8x128xf32>
    %4 = tpu.matmul %0, %3, %cst_5 {dimension_numbers = #tpu.dot_dimension_numbers<[1], [0], [0], [1], [0, 0, 1, 1], [], []>} : vector<8x32xf32>, vector<32x128xf32>, vector<8x128xf32> -> vector<8x128xf32>
    %5 = arith.mulf %2, %2 : vector<8x128xf32>
    %6 = arith.mulf %4, %4 : vector<8x128xf32>
    %7 = arith.addf %5, %6 : vector<8x128xf32>
    %8 = math.sqrt %7 : vector<8x128xf32>
    %c0_6 = arith.constant 0 : index
    %c0_7 = arith.constant 0 : index
    %9 = vector.load %arg4[%c0_6, %c0_7] : memref<8x128xf32, #tpu.memory_space<vmem>>, vector<8x128xf32>
    tpu.vector_store %arg4[%c0_6, %c0_7], %8 {strides = array<i32>} : memref<8x128xf32, #tpu.memory_space<vmem>>, vector<8x128xf32>,
    %10 = math.atan2 %2, %4 : vector<8x128xf32>
    %c0_8 = arith.constant 0 : index
    %c0_9 = arith.constant 0 : index
    %11 = vector.load %arg5[%c0_8, %c0_9] : memref<8x128xf32, #tpu.memory_space<vmem>>, vector<8x128xf32>
    tpu.vector_store %arg5[%c0_8, %c0_9], %10 {strides = array<i32>} : memref<8x128xf32, #tpu.memory_space<vmem>>, vector<8x128xf32>,
    return
  }
  func.func @transform_0(%arg0: i32) -> (i32, i32) {
    %c0_i32 = arith.constant 0 : i32
    %c0_i32_0 = arith.constant 0 : i32
    return %arg0, %c0_i32 : i32, i32
  }
  func.func @transform_1(%arg0: i32) -> (i32, i32) {
    %c0_i32 = arith.constant 0 : i32
    %c0_i32_0 = arith.constant 0 : i32
    %c0_i32_1 = arith.constant 0 : i32
    return %c0_i32, %c0_i32_0 : i32, i32
  }
  func.func @transform_2(%arg0: i32) -> (i32, i32) {
    %c0_i32 = arith.constant 0 : i32
    %c0_i32_0 = arith.constant 0 : i32
    %c0_i32_1 = arith.constant 0 : i32
    return %c0_i32, %c0_i32_0 : i32, i32
  }
  func.func @transform_3(%arg0: i32) -> (i32, i32) {
    %c0_i32 = arith.constant 0 : i32
    %c0_i32_0 = arith.constant 0 : i32
    return %arg0, %c0_i32 : i32, i32
  }
  func.func @transform_4(%arg0: i32) -> (i32, i32) {
    %c0_i32 = arith.constant 0 : i32
    %c0_i32_0 = arith.constant 0 : i32
    return %arg0, %c0_i32 : i32, i32
  }
}

</mosaic_0001>

<bundles_post_ra>
// kernel: tpu_custom_call.1
= control target key start
LH: loop header
LB: loop body
LE: loop exit
PB: predicated region body
PF: predicated region fallthrough
CT: control target
= control target key end

     0   :  { %10 = vsyncpa [#allocation3], 0  ;;  %s461_s0 = inlined_call_operand.hbm [shape: f32[8,32], index: 0, kind: input, shape index: {}]   ;;  %s462_s1 = inlined_call_operand.hbm [shape: f32[32,128], index: 1, kind: input, shape index: {}]   ;;  %s463_s2 = inlined_call_operand.hbm [shape: f32[32,128], index: 2, kind: input, shape index: {}]   ;;  %s464_s3 = inlined_call_operand.hbm [shape: f32[8,128], index: 3, kind: output, shape index: {0}]   ;;  %s465_s4 = inlined_call_operand.hbm [shape: f32[8,128], index: 4, kind: output, shape index: {1}]  }
   0x1   :  { %11 = vsyncpa [#allocation6], 0 }
   0x2   :  { %12 = vsyncpa [#allocation4], 0  ;;  %s29_s17 = sshll.u32 %s462_s1, 4  ;;  %s30_s17 = int_to_ptr.hbm [resolvable:$true] %s29_s17 }
   0x3   :  { %13 = vsyncpa [#allocation10], 0  ;;  %s370_s18 = smov [#allocation5]   ;;  %s19_s22 = sshll.u32 %s461_s0, 4  ;;  %s20_s22 = int_to_ptr.hbm [resolvable:$true] %s19_s22 }
   0x4   :  { %s31_s19 = sshll.u32 %s370_s18, 4  ;;  %s371_s23 = smov 128   ;;  %s32_s19 = int_to_ptr.vmem [resolvable:$true] %s31_s19 }
   0x5   :  { %s372_s24 = smov 8   ;;  %s373_s25 = smov [#allocation2]  }
   0x6   :  { %37 = dma.hbm_to_vmem [thread:$0]  %s30_s17, 512, %s32_s19, [#allocation6], %s371_s23, %s371_s23, %s372_s24  }
   0x7   :  { %s21_s26 = sshll.u32 %s373_s25, 4  ;;  %s42_s29 = sshll.u32 %s463_s2, 4  ;;  %s22_s26 = int_to_ptr.vmem [resolvable:$true] %s21_s26  ;;  %s43_s29 = int_to_ptr.hbm [resolvable:$true] %s42_s29 }
   0x8   :  { %24 = dma.hbm_to_vmem [thread:$0]  %s20_s22, 128, %s22_s26, [#allocation3]  }
   0x9   :  { %s374_s1 = smov [#allocation7]  }
   0xa   :  { %s44_s30 = sshll.u32 %s374_s1, 4  ;;  %s45_s30 = int_to_ptr.vmem [resolvable:$true] %s44_s30 }
   0xb   :  { %50 = dma.hbm_to_vmem [thread:$0]  %s43_s29, 512, %s45_s30, [#allocation6], %s371_s23, %s371_s23, %s372_s24  }
   0xc   :  { %362 = dma.done.wait [#allocation3], 128  }
   0xd   :  { %363 = vsyncadd [#allocation3], 4294967168 }
   0xe   :  { %364 = dma.done.wait [#allocation6], 1024  }
   0xf   :  { %365 = vsyncadd [#allocation6], 4294966272  ;;  %v67_v0 = vld [vmem:[#allocation5 + $0x18] sm:$0xff]  ;;  %v66_v2 = vld [vmem:[#allocation5 + $0x10] sm:$0xff]  ;;  %vm68_vm0 = vcmask 261120   ;;  %s375_s0 = smov [#allocation8]  }
  0x10   :  { %v95_v1 = vld [vmem:[#allocation7 + $0x18] sm:$0xff]  ;;  %84 = vmatpush.msra.mxu0 %v67_v0  ;;  %v94_v3 = vld [vmem:[#allocation7 + $0x10] sm:$0xff]  ;;  %v65_v4 = vld [vmem:[#allocation5 + $0x8] sm:$0xff]  ;;  %s198_s2 = sshll.u32 %s375_s0, 4  ;;  %s200_s7 = sshll.u32 %s464_s3, 4  ;;  %v376_v63 = vmov 0.0   ;;  %s199_s2 = int_to_ptr.vmem [resolvable:$true] %s198_s2  ;;  %s201_s7 = int_to_ptr.hbm [resolvable:$true] %s200_s7 }
  0x11   :  { %108 = vmatpush.msra.mxu1 %v95_v1  ;;  %v93_v5 = vld [vmem:[#allocation7 + $0x8] sm:$0xff]  ;;  %v64_v6 = vld [vmem:[#allocation5] sm:$0xff]  ;;  %v63_v8 = vld [vmem:[#allocation2] sm:$0xff]  ;;  %s378_s3 = smov [#allocation9]   ;;  %s211_s11 = sshll.u32 %s465_s4, 4  ;;  %s212_s11 = int_to_ptr.hbm [resolvable:$true] %s211_s11 }
  0x12   :  { %85 = vmatpush.msra.mxu0 %v66_v2  ;;  %v92_v7 = vld [vmem:[#allocation7] sm:$0xff]  ;;  %s209_s8 = sshll.u32 %s378_s3, 4  ;;  %s210_s8 = int_to_ptr.vmem [resolvable:$true] %s209_s8 }
  0x13   :  { %109 = vmatpush.msra.mxu1 %v94_v3  ;;  %v377_v3 = vmov 0.7853982  }
  0x14   :  { %86 = vmatpush.msra.mxu0 %v65_v4 }
  0x15   :  { %110 = vmatpush.msra.mxu1 %v93_v5 }
  0x16   :  { %87 = vmatpush.msra.mxu0 %v64_v6 }
  0x17   :  { %111 = vmatpush.msra.mxu1 %v92_v7  ;;  %227 = vmatmul.msk.f32.vlgmr.msra.gmra.mxu0 %vm68_vm0, %v63_v8 }
  0x18   :  { %228 = vmatmul.msk.f32.vlgmr.msra.gmra.mxu1 %vm68_vm0, %v63_v8 }
  0x94   :  { %v413_v9 = vpop.f32.mrf.mxu0 }
  0x95   :  { %v415_v10 = vpop.f32.mrf.mxu1  ;;  %v116_v11 = vmul.f32 %v413_v9, %v413_v9  ;;  %v420_v12 = vand.u32 2147483647, %v413_v9  ;;  %vm180_vm1 = vcmp.ne.f32.partialorder %v413_v9, %v413_v9  ;;  %vm177_vm0 = vcmp.eq.f32.partialorder %v413_v9, 0.0 }
  0x96   :  { %v117_v13 = vmul.f32 %v415_v10, %v415_v10  ;;  %v427_v14 = vand.u32 2147483647, %v415_v10  ;;  %vm179_vm2 = vcmp.ne.f32.partialorder %v415_v10, %v415_v10  ;;  %vm175_vm14 = vcmp.lt.s32.totalorder %v415_v10, 0 }
  0x97   :  { %vm186_vm3 = vcmp.eq.s32.totalorder %v420_v12, inf  ;;  %vm434_vm4 = vmor %vm179_vm2, %vm180_vm1  ;;  %vm172_vm15 = vcmp.lt.f32.partialorder %v415_v10, 0.0  ;;  %v176_v0 = vsel %vm175_vm14, 3.1415927, %v376_v63  ;;  %v190_v6 = vand.u32 2147483648, %v413_v9 }
  0x98   :  { %v118_v15 = vadd.f32 %v117_v13, %v116_v11  ;;  %v135_v16 = vmax.f32 %v427_v14, %v420_v12  ;;  %vm185_vm5 = vcmp.eq.s32.totalorder %v427_v14, inf  ;;  %v134_v32 = vmin.f32 %v427_v14, %v420_v12 }
  0x99   :  { %vm439_vm6 = vmand %vm185_vm5, %vm186_vm3  ;;  %vm169_vm13 = vcmp.gt.f32.partialorder %v420_v12, %v427_v14  ;;  %v184_v4 = vsel %vm172_vm15, 2.3561945, %v377_v3 }
  0x9a   :  { %238 = vrcp.f32 %v135_v16  ;;  %v147_v24 = vand.u32 2147483648, %v135_v16  ;;  %v145_v27 = vand.u32 2147483647, %v135_v16  ;;  %vm141_vm8 = vweird.f32 %v135_v16 }
  0x9b   :  { %240 = vrsqrt.f32 %v118_v15  ;;  %vm126_vm11 = vcmp.eq.f32.partialorder %v118_v15, inf  ;;  %v129_v39 = vand.u32 2147483648, %v118_v15  ;;  %vm128_vm12 = vcmp.eq.f32.partialorder %v118_v15, 0.0 }
  0x9c   :  { %v148_v30 = vor.u32 1.1754944e-38, %v147_v24  ;;  %vm146_vm10 = vcmp.eq.f32.partialorder %v145_v27, 8.507059e+37 }
  0xa0   :  { %v239_v19 = vpop.eup %238 }
  0xa1   :  { %v241_v20 = vpop.eup %240  ;;  %v137_v21 = vmul.f32 %v239_v19, %v135_v16  ;;  %vm142_vm7 = vweird.f32 %v239_v19 }
  0xa2   :  { %v120_v22 = vmul.f32 %v241_v20, %v118_v15  ;;  %vm143_vm9 = vmor %vm141_vm8, %vm142_vm7 }
  0xa3   :  { %v138_v23 = vsub.f32 1.0, %v137_v21 }
  0xa4   :  { %v121_v25 = vmul.f32 %v241_v20, %v120_v22 }
  0xa5   :  { %v139_v26 = vmul.f32 %v239_v19, %v138_v23 }
  0xa6   :  { %v122_v28 = vmul.f32 0.5, %v121_v25 }
  0xa7   :  { %v140_v29 = vadd.f32 %v239_v19, %v139_v26 }
  0xa8   :  { %v123_v31 = vsub.f32 1.5, %v122_v28 }
  0xa9   :  { %v144_v33 = vsel %vm143_vm9, %v239_v19, %v140_v29 }
  0xaa   :  { %v149_v34 = vsel %vm146_vm10, %v148_v30, %v144_v33  ;;  %v124_v35 = vmul.f32 %v241_v20, %v123_v31 }
  0xab   :  { %v150_v36 = vmul.f32 %v149_v34, %v134_v32 }
  0xac   :  { %v125_v37 = vmul.f32 %v124_v35, %v118_v15 }
  0xad   :  { %v151_v38 = vmul.f32 %v150_v36, %v150_v36 }
  0xae   :  { %v127_v40 = vsel %vm126_vm11, %v118_v15, %v125_v37 }
  0xaf   :  { %v152_v41 = vmul.f32 0.002785687, %v151_v38  ;;  %v130_v42 = vsel %vm128_vm12, %v129_v39, %v127_v40 }
  0xb0   :  { %131 = vst [vmem:[#allocation8] sm:$0xff] %v130_v42 }
  0xb1   :  { %v153_v43 = vadd.f32 -0.015866, %v152_v41  ;;  %203 = dma.vmem_to_hbm [thread:$0]  %s199_s2, 128, %s201_s7, [#allocation4]  }
  0xb3   :  { %v154_v44 = vmul.f32 %v153_v43, %v151_v38 }
  0xb5   :  { %v155_v45 = vadd.f32 0.04247222, %v154_v44 }
  0xb7   :  { %v156_v46 = vmul.f32 %v155_v45, %v151_v38 }
  0xb9   :  { %v157_v47 = vadd.f32 -0.074975304, %v156_v46 }
  0xbb   :  { %v158_v48 = vmul.f32 %v157_v47, %v151_v38 }
  0xbd   :  { %v159_v49 = vadd.f32 0.1064488, %v158_v48 }
  0xbf   :  { %v160_v50 = vmul.f32 %v159_v49, %v151_v38 }
  0xc1   :  { %v161_v51 = vadd.f32 -0.14207031, %v160_v50 }
  0xc3   :  { %v162_v52 = vmul.f32 %v161_v51, %v151_v38 }
  0xc5   :  { %v163_v53 = vadd.f32 0.19993454, %v162_v52 }
  0xc7   :  { %v164_v54 = vmul.f32 %v163_v53, %v151_v38 }
  0xc9   :  { %v165_v55 = vadd.f32 -0.33333147, %v164_v54 }
  0xcb   :  { %v166_v56 = vmul.f32 %v165_v55, %v151_v38 }
  0xcd   :  { %v167_v57 = vmul.f32 %v166_v56, %v150_v36 }
  0xcf   :  { %v168_v58 = vadd.f32 %v167_v57, %v150_v36 }
  0xd1   :  { %v170_v59 = vsub.f32 1.5707964, %v168_v58 }
  0xd3   :  { %v171_v60 = vsel %vm169_vm13, %v170_v59, %v168_v58 }
  0xd4   :  { %v173_v61 = vsub.f32 3.1415927, %v171_v60 }
  0xd6   :  { %v174_v62 = vsel %vm172_vm15, %v173_v61, %v171_v60 }
  0xd7   :  { %v178_v1 = vsel %vm177_vm0, %v176_v0, %v174_v62 }
  0xd8   :  { %v182_v2 = vsel %vm434_vm4, nan, %v178_v1 }
  0xd9   :  { %v188_v5 = vsel %vm439_vm6, %v184_v4, %v182_v2 }
  0xda   :  { %v189_v7 = vand.u32 2147483647, %v188_v5 }
  0xdc   :  { %v191_v8 = vor.u32 %v190_v6, %v189_v7 }
  0xde   :  { %192 = vst [vmem:[#allocation9] sm:$0xff] %v191_v8 }
  0xdf   :  { %214 = dma.vmem_to_hbm [thread:$0]  %s210_s8, 128, %s212_s11, [#allocation10]  }
  0xe0   :  { %366 = dma.done.wait [#allocation4], 128  }
  0xe1   :  { %367 = vsyncadd [#allocation4], 4294967168 }
  0xe2   :  { %368 = dma.done.wait [#allocation10], 128  }
  0xe3   :  { %369 = vsyncadd [#allocation10], 4294967168 }
  0xe4   :  { %223 = vsyncpa [#allocation3], 1 }
  0xe5   :  { %224 = vsyncpa [#allocation6], 1 }
  0xe6   :  { %225 = vsyncpa [#allocation4], 1 }
  0xe7   :  { %226 = vsyncpa [#allocation10], 1 }

</bundles_post_ra>
